<compile_context>
chip_gen: v5e
topology: v5e:2x2
jax: 0.10.0
libtpu: 0.0.40
codegen_flags: <defaults>
</compile_context>

<pallas_src>
import functools

import jax
import jax.numpy as jnp
from jax import lax
from jax.experimental import pallas as pl
from jax.experimental.pallas import tpu as pltpu


def _round_up(x, m):
    return ((x + m - 1) // m) * m


def _pick_batch_tile(B, C, dtype):
    """Largest multiple-of-8 batch tile that fits a conservative VMEM budget."""
    itemsize = jnp.dtype(dtype).itemsize
    budget = 12 * 1024 * 1024  # bytes; safe under default scoped limits on v5e/v6e/v7x
    # per-row: double-buffered input DMA + ~3 live fp32 (row, C) temporaries.
    per_row = 2 * C * itemsize + 3 * C * 4
    tb = budget // max(per_row, 1)
    tb = min(tb, 2048)                 # keep tiles reasonable
    tb = min(tb, _round_up(B, 8))      # no point tiling past (padded) batch
    tb = max(8, (tb // 8) * 8)         # sublane-aligned
    return int(tb)


def _ce_label_smooth_kernel(logits_ref, targets_ref, out_ref, *,
                            epsilon: float, num_classes: int,
                            true_batch: int, batch_tile: int):
    i = pl.program_id(0)

    # (tb, C) logits tile, fp32 for the softmax math (inputs may be bf16).
    x = logits_ref[...].astype(jnp.float32)
    t = targets_ref[...]                                   # (tb, 1) int32

    # Numerically stable pieces of log-softmax along the class axis.
    m = jnp.max(x, axis=-1, keepdims=True)                 # (tb, 1)
    shifted = x - m                                        # (tb, C)
    lse = jnp.log(jnp.sum(jnp.exp(shifted), axis=-1, keepdims=True))  # (tb, 1)

    # shifted[row, target[row]] via iota-compare (no one-hot materialization).
    cls = lax.broadcasted_iota(jnp.int32, x.shape, 1)
    shifted_tgt = jnp.sum(jnp.where(cls == t, shifted, 0.0),
                          axis=-1, keepdims=True)          # (tb, 1)
    sum_shifted = jnp.sum(shifted, axis=-1, keepdims=True)  # (tb, 1)

    # -sum_c smooth_c * log_probs_c
    #   = lse - (1-eps)*shifted[target] - (eps/C)*sum_c shifted_c
    row_loss = (lse
                - (1.0 - epsilon) * shifted_tgt
                - (epsilon / num_classes) * sum_shifted)    # (tb, 1)

    # Mask padded rows (global row index >= true batch size).
    row_ids = i * batch_tile + lax.broadcasted_iota(jnp.int32, (batch_tile, 1), 0)
    row_loss = jnp.where(row_ids < true_batch, row_loss, 0.0)

    # Lane-dense per-tile partial; collapsed to scalar (and divided by B) in JAX.
    partial = jnp.sum(row_loss)
    out_ref[...] = jnp.full((1, 128), partial, dtype=jnp.float32)


def cross_entropy_label_smooth(logits, targets, *, num_classes, epsilon,
                               batch_tile=None,
                               vmem_limit_bytes=32 * 1024 * 1024):
    """logits: [B, C] float (f32 or bf16), targets: [B] int. Returns f32 scalar."""
    B, C = logits.shape
    assert C == num_classes
    assert targets.shape == (B,)

    if batch_tile is None:
        batch_tile = _pick_batch_tile(B, C, logits.dtype)
    batch_tile = max(8, (int(batch_tile) // 8) * 8)

    num_tiles = pl.cdiv(B, batch_tile)
    B_pad = num_tiles * batch_tile
    if B_pad != B:
        logits = jnp.pad(logits, ((0, B_pad - B), (0, 0)))
        targets = jnp.pad(targets, (0, B_pad - B))
    targets_2d = targets.astype(jnp.int32).reshape(B_pad, 1)

    kernel = functools.partial(
        _ce_label_smooth_kernel,
        epsilon=float(epsilon),
        num_classes=int(num_classes),
        true_batch=int(B),
        batch_tile=int(batch_tile),
    )

    partials = pl.pallas_call(
        kernel,
        out_shape=jax.ShapeDtypeStruct((num_tiles, 128), jnp.float32),
        grid_spec=pltpu.PrefetchScalarGridSpec(
            num_scalar_prefetch=0,
            grid=(num_tiles,),
            in_specs=[
                pl.BlockSpec((batch_tile, C), lambda i: (i, 0)),
                pl.BlockSpec((batch_tile, 1), lambda i: (i, 0)),
            ],
            out_specs=pl.BlockSpec((1, 128), lambda i: (i, 0)),
        ),
        compiler_params=pltpu.CompilerParams(
            dimension_semantics=("parallel",),   # each tile writes its own block
            vmem_limit_bytes=int(vmem_limit_bytes),
        ),
    )(logits, targets_2d)

    # Finalize once: sum per-tile partials and apply the 1/B (mean over batch).
    return jnp.sum(partials[:, 0]) * jnp.float32(1.0 / B)


def _reference(logits, targets, num_classes, epsilon):
    log_probs = jax.nn.log_softmax(logits.astype(jnp.float32), axis=1)
    onehot = jax.nn.one_hot(targets, num_classes, dtype=jnp.float32)
    smooth = (1.0 - epsilon) * onehot + epsilon / num_classes
    return jnp.sum(jnp.mean(-smooth * log_probs, axis=0))


if __name__ == "__main__":
    key = jax.random.PRNGKey(0)
    NUM_CLASSES = 128
    EPSILON = 0.1

    # Test 1: small batch, auto tile (single grid step).
    k1, k2, k3, k4 = jax.random.split(key, 4)
    B1 = 16
    logits1 = jax.random.normal(k1, (B1, NUM_CLASSES), dtype=jnp.float32)
    targets1 = jax.random.randint(k2, (B1,), 0, NUM_CLASSES, dtype=jnp.int32)
    loss1 = jax.block_until_ready(
        cross_entropy_label_smooth(logits1, targets1,
                                   num_classes=NUM_CLASSES, epsilon=EPSILON))
    ref1 = _reference(logits1, targets1, NUM_CLASSES, EPSILON)
    assert jnp.allclose(loss1, ref1, rtol=1e-5, atol=1e-5), (loss1, ref1)

    # Test 2: batch not divisible by the tile -> exercises padding + masking
    # and the multi-tile "parallel" per-tile-partial path.
    B2 = 40
    logits2 = jax.random.normal(k3, (B2, NUM_CLASSES), dtype=jnp.float32)
    targets2 = jax.random.randint(k4, (B2,), 0, NUM_CLASSES, dtype=jnp.int32)
    loss2 = jax.block_until_ready(
        cross_entropy_label_smooth(logits2, targets2,
                                   num_classes=NUM_CLASSES, epsilon=EPSILON,
                                   batch_tile=16))
    ref2 = _reference(logits2, targets2, NUM_CLASSES, EPSILON)
    assert jnp.allclose(loss2, ref2, rtol=1e-5, atol=1e-5), (loss2, ref2)

    # Test 3: bf16 logits on the wire (half the DMA volume; fp32 math in-kernel).
    logits3 = logits1.astype(jnp.bfloat16)
    loss3 = jax.block_until_ready(
        cross_entropy_label_smooth(logits3, targets1,
                                   num_classes=NUM_CLASSES, epsilon=EPSILON))
    ref3 = _reference(logits3, targets1, NUM_CLASSES, EPSILON)
    assert jnp.allclose(loss3, ref3, rtol=1e-4, atol=1e-4), (loss3, ref3)

    print("KERNEL_OK")
</pallas_src>

<mosaic_0001>
module attributes {stable_mosaic.version = 11 : i64} {
  func.func @_ce_label_smooth_kernel(%arg0: i32, %arg1: memref<16x128xf32, #tpu.memory_space<vmem>>, %arg2: memref<16x1xi32, #tpu.memory_space<vmem>>, %arg3: memref<1x128xf32, #tpu.memory_space<vmem>>) attributes {dimension_semantics = [#tpu.dimension_semantics<parallel>], iteration_bounds = array<i64: 1>, scalar_prefetch = 0 : i64, scratch_operands = 0 : i64, tpu.core_type = #tpu.core_type<tc>, window_params = [{transform_indices = @transform_0, window_bounds = array<i64: 16, 128>}, {transform_indices = @transform_1, window_bounds = array<i64: 16, 1>}, {transform_indices = @transform_2, window_bounds = array<i64: 1, 128>}]} {
    %c0 = arith.constant 0 : index
    %c0_0 = arith.constant 0 : index
    %0 = vector.load %arg1[%c0, %c0_0] : memref<16x128xf32, #tpu.memory_space<vmem>>, vector<16x128xf32>
    %c0_1 = arith.constant 0 : index
    %c0_2 = arith.constant 0 : index
    %1 = vector.load %arg2[%c0_1, %c0_2] : memref<16x1xi32, #tpu.memory_space<vmem>>, vector<16x1xi32>
    %cst = arith.constant dense<0xFF800000> : vector<16xf32>
    %2 = vector.multi_reduction <maximumf>, %0, %cst [1] : vector<16x128xf32> to vector<16xf32>
    %3 = vector.shape_cast %2 : vector<16xf32> to vector<16x1xf32>
    %4 = vector.broadcast %3 : vector<16x1xf32> to vector<16x128xf32>
    %5 = arith.subf %0, %4 : vector<16x128xf32>
    %6 = math.exp %5 : vector<16x128xf32>
    %cst_3 = arith.constant dense<0.000000e+00> : vector<16xf32>
    %7 = vector.multi_reduction <add>, %6, %cst_3 [1] : vector<16x128xf32> to vector<16xf32>
    %8 = vector.shape_cast %7 : vector<16xf32> to vector<16x1xf32>
    %9 = math.log %8 : vector<16x1xf32>
    %10 = tpu.iota {dimensions = array<i32: 1>} : vector<16x128xi32>
    %11 = vector.broadcast %1 : vector<16x1xi32> to vector<16x128xi32>
    %12 = arith.cmpi eq, %10, %11 : vector<16x128xi32>
    %cst_4 = arith.constant 0.000000e+00 : f32
    %13 = vector.broadcast %cst_4 : f32 to vector<16x128xf32>
    %14 = arith.select %12, %5, %13 : vector<16x128xi1>, vector<16x128xf32>
    %cst_5 = arith.constant dense<0.000000e+00> : vector<16xf32>
    %15 = vector.multi_reduction <add>, %14, %cst_5 [1] : vector<16x128xf32> to vector<16xf32>
    %16 = vector.shape_cast %15 : vector<16xf32> to vector<16x1xf32>
    %cst_6 = arith.constant dense<0.000000e+00> : vector<16xf32>
    %17 = vector.multi_reduction <add>, %5, %cst_6 [1] : vector<16x128xf32> to vector<16xf32>
    %18 = vector.shape_cast %17 : vector<16xf32> to vector<16x1xf32>
    %cst_7 = arith.constant 0.899999976 : f32
    %19 = vector.broadcast %cst_7 : f32 to vector<16x1xf32>
    %20 = arith.mulf %19, %16 : vector<16x1xf32>
    %21 = arith.subf %9, %20 : vector<16x1xf32>
    %cst_8 = arith.constant 7.812500e-04 : f32
    %22 = vector.broadcast %cst_8 : f32 to vector<16x1xf32>
    %23 = arith.mulf %22, %18 : vector<16x1xf32>
    %24 = arith.subf %21, %23 : vector<16x1xf32>
    %c16_i32 = arith.constant 16 : i32
    %25 = arith.muli %arg0, %c16_i32 : i32
    %26 = tpu.iota {dimensions = array<i32: 0>} : vector<16x1xi32>
    %27 = vector.broadcast %25 : i32 to vector<16x1xi32>
    %28 = arith.addi %27, %26 : vector<16x1xi32>
    %c16_i32_9 = arith.constant 16 : i32
    %29 = vector.broadcast %c16_i32_9 : i32 to vector<16x1xi32>
    %30 = arith.cmpi slt, %28, %29 : vector<16x1xi32>
    %cst_10 = arith.constant 0.000000e+00 : f32
    %31 = vector.broadcast %cst_10 : f32 to vector<16x1xf32>
    %32 = arith.select %30, %24, %31 : vector<16x1xi1>, vector<16x1xf32>
    %33 = vector.shape_cast %32 : vector<16x1xf32> to vector<1x16x1xf32>
    %cst_11 = arith.constant dense<0.000000e+00> : vector<1xf32>
    %34 = vector.multi_reduction <add>, %33, %cst_11 [1, 2] : vector<1x16x1xf32> to vector<1xf32>
    %35 = vector.shape_cast %34 : vector<1xf32> to vector<1x1x1xf32>
    %36 = vector.extract %35[0, 0, 0] : f32 from vector<1x1x1xf32>
    %37 = vector.broadcast %36 : f32 to vector<1x128xf32>
    %c0_12 = arith.constant 0 : index
    %c0_13 = arith.constant 0 : index
    %38 = vector.load %arg3[%c0_12, %c0_13] : memref<1x128xf32, #tpu.memory_space<vmem>>, vector<1x128xf32>
    tpu.vector_store %arg3[%c0_12, %c0_13], %37 {strides = array<i32>} : memref<1x128xf32, #tpu.memory_space<vmem>>, vector<1x128xf32>,
    return
  }
  func.func @transform_0(%arg0: i32) -> (i32, i32) {
    %c0_i32 = arith.constant 0 : i32
    %c0_i32_0 = arith.constant 0 : i32
    return %arg0, %c0_i32 : i32, i32
  }
  func.func @transform_1(%arg0: i32) -> (i32, i32) {
    %c0_i32 = arith.constant 0 : i32
    %c0_i32_0 = arith.constant 0 : i32
    return %arg0, %c0_i32 : i32, i32
  }
  func.func @transform_2(%arg0: i32) -> (i32, i32) {
    %c0_i32 = arith.constant 0 : i32
    %c0_i32_0 = arith.constant 0 : i32
    return %arg0, %c0_i32 : i32, i32
  }
}

</mosaic_0001>

<bundles_post_ra>
// kernel: tpu_custom_call.1
= control target key start
LH: loop header
LB: loop body
LE: loop exit
PB: predicated region body
PF: predicated region fallthrough
CT: control target
= control target key end

     0   :  { %v144_v2 = vmov 0   ;;  %s176_s0 = inlined_call_operand.vmem [shape: f32[16,128], index: 0, kind: input, shape index: {}]   ;;  %s177_s1 = inlined_call_operand.vmem [shape: s32[16,1], index: 1, kind: input, shape index: {}]   ;;  %s178_s2 = inlined_call_operand.hbm [shape: f32[1,128], index: 2, kind: output, shape index: {}]  }
   0x1   :  { %v12_v0 = vld [vmem:[%s176_s0] sm:$0xff]  ;;  %108 = vset.pattern.permute.xlu1 %v144_v2 }
   0x2   :  { %v14_v1 = vld [vmem:[%s177_s1] sm:$0xff]  ;;  %16 = vmax.xlane.f32.xlu0 %v12_v0 }
   0x3   :  { %7 = vsyncpa [#allocation3], 0  ;;  %37 = vperm.xlu1 %108, %v14_v1   ;;  %109 = vset.pattern.permute.xlu0 %v144_v2  ;;  %v13_v3 = vld [vmem:[%s176_s0 + $0x8] sm:$0xff]  ;;  %v34_v5 = vlaneseq  ;;  %vm73_vm2 = vcmask 7168   ;;  %s145_s0 = smov [#allocation2]   ;;  %s95_s19 = sshll.u32 %s178_s2, 4  ;;  %s96_s19 = int_to_ptr.hbm [resolvable:$true] %s95_s19 }
   0x4   :  { %v15_v4 = vld [vmem:[%s177_s1 + $0x8] sm:$0xff]  ;;  %s93_s1 = sshll.u32 %s145_s0, 4  ;;  %s94_s1 = int_to_ptr.vmem [resolvable:$true] %s93_s1 }
   0x5   :  { %v35_v6 = vand.u32 127, %v34_v5 }
   0xa   :  { %18 = vmax.xlane.f32.xlu0 %v13_v3 }
   0xb   :  { %40 = vperm.xlu1 %108, %v15_v4  }
  0x75   :  { %v17_v7 = vpop.xlane.xlu0 %16  ;;  %v38_v8 = vpop.permute.xlu1 %37 }
  0x76   :  { %v20_v9 = vsub.f32 %v12_v0, %v17_v7  ;;  %vm42_vm0 = vcmp.eq.s32.totalorder %v35_v6, %v38_v8 }
  0x78   :  { %v44_v10 = vsel %vm42_vm0, %v20_v9, 0.0  ;;  %v22_v11 = vmul.f32 1.442695, %v20_v9 }
  0x79   :  { %46 = vadd.xlane.f32.xlu0 %v44_v10 }
  0x7a   :  { %110 = vpow2.f32 %v22_v11 }
  0x7d   :  { %v19_v12 = vpop.xlane.xlu0 %18  ;;  %v41_v13 = vpop.permute.xlu1 %40 }
  0x7e   :  { %v21_v14 = vsub.f32 %v13_v3, %v19_v12  ;;  %vm43_vm1 = vcmp.eq.s32.totalorder %v35_v6, %v41_v13 }
  0x80   :  { %v111_v15 = vpop.eup %110  ;;  %v24_v16 = vmul.f32 1.442695, %v21_v14  ;;  %v45_v17 = vsel %vm43_vm1, %v21_v14, 0.0 }
  0x81   :  { %26 = vadd.xlane.f32.xlu2 %v111_v15  ;;  %52 = vadd.xlane.f32.xlu0 %v21_v14 }
  0x82   :  { %112 = vpow2.f32 %v24_v16  ;;  %48 = vadd.xlane.f32.xlu1 %v45_v17 }
  0x88   :  { %v113_v18 = vpop.eup %112 }
  0x89   :  { %28 = vadd.xlane.f32.xlu2 %v113_v18 }
  0x91   :  { %50 = vadd.xlane.f32.xlu2 %v20_v9 }
  0xec   :  { %v47_v20 = vpop.xlane.xlu0 %46 }
  0xed   :  { %v54_v26 = vmul.f32 0.9, %v47_v20 }
  0xf4   :  { %v27_v19 = vpop.xlane.xlu2 %26  ;;  %v53_v27 = vpop.xlane.xlu0 %52 }
  0xf5   :  { %114 = vlog2.f32 %v27_v19  ;;  %v49_v24 = vpop.xlane.xlu1 %48  ;;  %v59_v33 = vmul.f32 0.00078125, %v53_v27 }
  0xf6   :  { %v55_v28 = vmul.f32 0.9, %v49_v24 }
  0xfb   :  { %v115_v22 = vpop.eup %114 }
  0xfc   :  { %v29_v21 = vpop.xlane.xlu2 %28  ;;  %v31_v23 = vmul.f32 0.6931472, %v115_v22 }
  0xfd   :  { %116 = vlog2.f32 %v29_v21 }
  0xfe   :  { %v56_v31 = vsub.f32 %v31_v23, %v54_v26 }
 0x103   :  { %v117_v25 = vpop.eup %116 }
 0x104   :  { %v33_v29 = vmul.f32 0.6931472, %v117_v25  ;;  %v51_v30 = vpop.xlane.xlu2 %50 }
 0x105   :  { %v58_v32 = vmul.f32 0.00078125, %v51_v30 }
 0x106   :  { %v57_v34 = vsub.f32 %v33_v29, %v55_v28 }
 0x107   :  { %v60_v35 = vsub.f32 %v56_v31, %v58_v32 }
 0x108   :  { %v61_v36 = vsub.f32 %v57_v34, %v59_v33 }
 0x109   :  { %v74_v37 = vsel %vm73_vm2, %v60_v35, 0.0 }
 0x10a   :  { %v75_v38 = vsel %vm73_vm2, %v61_v36, 0.0 }
 0x10b   :  { %v76_v39 = vadd.f32 %v75_v38, %v74_v37 }
 0x10d   :  { %77 = vadd.xlane.f32.xlu2 %v76_v39 }
 0x180   :  { %v78_v40 = vpop.xlane.xlu2 %77 }
 0x181   :  { %v79_v41 = vrot.slane %v78_v40, 4 }
 0x183   :  { %v80_v42 = vadd.f32 %v79_v41, %v78_v40 }
 0x185   :  { %v81_v43 = vrot.slane %v80_v42, 2 }
 0x187   :  { %v82_v44 = vadd.f32 %v81_v43, %v80_v42 }
 0x189   :  { %v83_v45 = vrot.slane %v82_v44, 1 }
 0x18b   :  { %v84_v46 = vadd.f32 %v83_v45, %v82_v44 }
 0x18d   :  { %104 = vpush %v84_v46 }
 0x1be   :  { %s105_s20 = spop %104 }
 0x1bf   :  { %v86_v47 = vstv %s105_s20 }
 0x1c0   :  { %87 = vst [vmem:[#allocation2] sm:$0x1] %v86_v47 }
 0x1c1   :  { %98 = dma.vmem_to_hbm [thread:$0]  %s94_s1, 16, %s96_s19, [#allocation3]  }
 0x1c2   :  { %142 = dma.done.wait [#allocation3], 16  }
 0x1c3   :  { %143 = vsyncadd [#allocation3], 4294967280 }
 0x1c4   :  { %103 = vsyncpa [#allocation3], 1 }

</bundles_post_ra>
